<compile_context>
chip_gen: v7x
topology: tpu7x:2x2x1
jax: 0.10.0
libtpu: 0.0.40
codegen_flags: <defaults>
</compile_context>

<pallas_src>
import jax
import jax.numpy as jnp
from jax import lax
from jax.experimental import pallas as pl
from jax.experimental.pallas import tpu as pltpu

LANE = 128


def _cdiv(a: int, b: int) -> int:
    return (a + b - 1) // b


def _round_up(x: int, m: int) -> int:
    return _cdiv(x, m) * m


def _vmem_budget():
    """Per-generation (input-block byte budget, vmem_limit_bytes)."""
    try:
        cap = int(getattr(pltpu.get_tpu_info(), "vmem_capacity_bytes", 0) or 0)
    except Exception:
        cap = 0
    if cap <= 0:
        cap = 64 << 20                      # conservative (v7x-sized) fallback
    vmem_limit = min(cap * 3 // 4, 96 << 20)    # 48 MiB on v7x, 96 MiB v5e/v6e
    block_budget = min(8 << 20, vmem_limit // 4)  # 2x double-buffer << limit
    return block_budget, vmem_limit


def _choose_spatial_tiling(chunks: int, k_budget: int, n_s_min: int):
    """Pick (k, n_s, padded_chunks): T = k*128 lanes, n_s spatial grid steps,
    k * n_s == padded_chunks >= chunks, k <= k_budget.  Prefers an exact
    divisor of `chunks` (zero spatial padding); falls back to a balanced
    split with at most ~n_s*127 padded lanes."""
    k_budget = max(1, k_budget)
    n_s_req = max(n_s_min, _cdiv(chunks, k_budget))
    if n_s_req <= 1:
        return chunks, 1, chunks
    k_cap = max(1, chunks // n_s_req)
    best = 1
    for k in range(k_cap, 0, -1):
        if chunks % k == 0:
            best = k
            break
    if best * 2 > k_cap:                       # divisor split is big enough
        return best, chunks // best, chunks
    n_s = n_s_req                              # balanced split, small pad
    k = _cdiv(chunks, n_s)
    return k, n_s, k * n_s


# ----------------------------------------------------------------------------
# Fast path: all channels in one block — single pass, no scratch, no pl.when
# ----------------------------------------------------------------------------
def _argmax_channels_single_kernel(x_ref, o_ref):
    # x_ref: (C, T) tile (batch dim squeezed), o_ref: (1, T) int32
    x = x_ref[...]                                          # native dtype
    c = x.shape[0]
    m = jnp.max(x, axis=0, keepdims=True)                   # (1, T)
    row = lax.broadcasted_iota(jnp.int32, x.shape, 0)       # (C, T)
    idx = jnp.min(jnp.where(x == m, row, jnp.int32(c)),
                  axis=0, keepdims=True)                    # first max
    o_ref[...] = jnp.minimum(idx, jnp.int32(c - 1))         # stay in range


# ----------------------------------------------------------------------------
# Channel-tiled path (huge C): running (max, argmax) accumulators in VMEM,
# invalid / partial-edge channel rows masked in-kernel (no wrapper-side pad).
# ----------------------------------------------------------------------------
def _make_argmax_channels_tiled_kernel(c_total: int, acc_dtype, sentinel):
    def kernel(x_ref, o_ref, bv_ref, bi_ref):
        ci = pl.program_id(2)
        c_tile = x_ref.shape[0]

        @pl.when(ci == 0)
        def _init():
            bv_ref[...] = jnp.full_like(bv_ref, sentinel)
            bi_ref[...] = jnp.zeros_like(bi_ref)

        base = ci * c_tile
        x = x_ref[...].astype(acc_dtype)
        row = lax.broadcasted_iota(jnp.int32, x.shape, 0)
        # in-kernel channel mask: rows past C (garbage in the partial edge
        # block) can never win the argmax
        x = jnp.where(row + base < c_total, x, sentinel)
        m = jnp.max(x, axis=0, keepdims=True)
        local = jnp.min(jnp.where(x == m, row, jnp.int32(c_tile)),
                        axis=0, keepdims=True) + base
        take = m > bv_ref[...]      # strict '>' keeps earliest channel on ties
        bi_ref[...] = jnp.where(take, local, bi_ref[...])
        bv_ref[...] = jnp.where(take, m, bv_ref[...])

        @pl.when(ci == pl.num_programs(2) - 1)
        def _finalize():
            o_ref[...] = bi_ref[...]

    return kernel


# ----------------------------------------------------------------------------
# Wrapper: argmax(x, dim=1) for NCHW input, returns int32 indices (B, H, W)
# ----------------------------------------------------------------------------
def argmax_dim1(x: jax.Array, *, force_c_tile: int | None = None) -> jax.Array:
    B, C, H, W = x.shape
    HW = H * W
    itemsize = x.dtype.itemsize
    block_budget, vmem_limit = _vmem_budget()

    # --- accumulator dtype / sentinel (exact for floats and signed ints) -----
    if jnp.issubdtype(x.dtype, jnp.floating):
        acc_dtype, sentinel = jnp.float32, float("-inf")
    elif jnp.issubdtype(x.dtype, jnp.signedinteger):
        acc_dtype, sentinel = jnp.int32, int(jnp.iinfo(jnp.int32).min)
    else:
        # TODO(synk): unsigned/exotic dtypes fall back to f32 compare
        acc_dtype, sentinel = jnp.float32, float("-inf")

    # --- channel tiling -------------------------------------------------------
    sublane = 8 * max(1, 4 // itemsize)        # 8 (f32) / 16 (bf16) / 32 (int8)
    if force_c_tile is not None and force_c_tile < C:
        c_tile = max(sublane, (force_c_tile // sublane) * sublane)
    elif C * LANE * itemsize <= block_budget:
        c_tile = C                              # single-pass fast path
    else:
        c_tile = max(sublane, (block_budget // (512 * itemsize) // sublane) * sublane)
        c_tile = min(c_tile, _round_up(C, sublane))
    single_pass = c_tile >= C
    if single_pass:
        c_tile = C
    n_c = 1 if single_pass else _cdiv(C, c_tile)

    # --- spatial tiling from the VMEM byte budget ----------------------------
    chunks = _cdiv(HW, LANE)
    k_budget = max(1, block_budget // (c_tile * itemsize * LANE))
    n_s_min = 1 if B > 1 else min(chunks, 2)   # give both TCs work when B == 1
    k, n_s, padded_chunks = _choose_spatial_tiling(chunks, k_budget, n_s_min)
    T = k * LANE
    HW_pad = padded_chunks * LANE

    # --- lane-dense layout; spatial-only pad (channels masked in-kernel) -----
    xr = x.reshape(B, C, HW)
    if HW_pad != HW:
        # padded columns are discarded after the kernel -> pad value irrelevant
        xr = jnp.pad(xr, ((0, 0), (0, 0), (0, HW_pad - HW)))

    cost = pl.CostEstimate(
        flops=int(B * C * HW_pad),
        transcendentals=0,
        bytes_accessed=int(B * C * HW_pad * itemsize + B * HW_pad * 4),
    )

    if single_pass:
        grid = (B, n_s)
        out3 = pl.pallas_call(
            _argmax_channels_single_kernel,
            out_shape=jax.ShapeDtypeStruct((B, 1, HW_pad), jnp.int32),
            grid_spec=pltpu.PrefetchScalarGridSpec(
                num_scalar_prefetch=0,
                grid=grid,
                in_specs=[pl.BlockSpec((pl.Squeezed(), C, T),
                                       lambda b, s: (b, 0, s))],
                out_specs=pl.BlockSpec((pl.Squeezed(), 1, T),
                                       lambda b, s: (b, 0, s))),
            compiler_params=pltpu.CompilerParams(
                dimension_semantics=("parallel", "parallel"),
                vmem_limit_bytes=vmem_limit),
            cost_estimate=cost,
        )(xr)
    else:
        grid = (B, n_s, n_c)                   # reduction (channel) axis LAST
        kernel = _make_argmax_channels_tiled_kernel(C, acc_dtype, sentinel)
        out3 = pl.pallas_call(
            kernel,
            out_shape=jax.ShapeDtypeStruct((B, 1, HW_pad), jnp.int32),
            grid_spec=pltpu.PrefetchScalarGridSpec(
                num_scalar_prefetch=0,
                grid=grid,
                in_specs=[pl.BlockSpec((pl.Squeezed(), c_tile, T),
                                       lambda b, s, c: (b, c, s))],
                out_specs=pl.BlockSpec((pl.Squeezed(), 1, T),
                                       lambda b, s, c: (b, 0, s)),
                scratch_shapes=[pltpu.VMEM((1, T), acc_dtype),
                                pltpu.VMEM((1, T), jnp.int32)]),
            compiler_params=pltpu.CompilerParams(
                dimension_semantics=("parallel", "parallel", "arbitrary"),
                vmem_limit_bytes=vmem_limit),
            cost_estimate=cost,
        )(xr)

    out = out3[:, 0, :HW] if HW_pad != HW else out3[:, 0, :]
    return out.reshape(B, H, W)


# ----------------------------------------------------------------------------
# TupleDecouple: apply `module` to xtuple[idx], pass everything else through
# ----------------------------------------------------------------------------
class TupleDecouple:
    # TODO(synk): the original wraps an *arbitrary* nn.Module; only the concrete
    # argmax-over-channels inner module is kernelized here — the tuple splice
    # itself is zero-compute Python and needs no kernel.
    def __init__(self, module, idx: int = 0) -> None:
        self.module = module
        self.idx = idx

    def __call__(self, xtuple):
        return (*xtuple[:self.idx],
                self.module(xtuple[self.idx]),
                *xtuple[self.idx + 1:])


if __name__ == "__main__":
    key = jax.random.PRNGKey(0)
    k0, k1, k2 = jax.random.split(key, 3)

    # -- small demo shapes consistent with the module -------------------------
    B, C, H, W = 2, 4, 16, 16
    x0 = jax.random.normal(k0, (B, C, H, W), dtype=jnp.float32)   # processed
    x1 = jax.random.normal(k1, (B, 8, 32), dtype=jnp.float32)     # pass-through

    td = TupleDecouple(argmax_dim1, idx=0)
    y0, y1 = td((x0, x1))
    jax.block_until_ready((y0, y1))

    ref0 = jnp.argmax(x0, axis=1).astype(jnp.int32)
    assert y0.shape == (B, H, W), y0.shape
    assert bool(jnp.all(y0 == ref0)), "mismatch vs jnp.argmax reference"
    assert y1 is x1 or bool(jnp.all(y1 == x1)), "pass-through element modified"

    # -- padded-spatial (HW % 128 != 0) path, single-pass and channel-tiled ----
    xb = jax.random.normal(k2, (1, 19, 33, 37), dtype=jnp.float32)
    yb = argmax_dim1(xb)                        # fast path, no scratch
    yc = argmax_dim1(xb, force_c_tile=8)        # tiled path + in-kernel masking
    jax.block_until_ready((yb, yc))
    refb = jnp.argmax(xb, axis=1).astype(jnp.int32)
    assert bool(jnp.all(yb == refb)), "mismatch on single-pass padded path"
    assert bool(jnp.all(yc == refb)), "mismatch on channel-tiled masked path"

    print("KERNEL_OK")
</pallas_src>

<mosaic_0001>
module attributes {stable_mosaic.version = 11 : i64} {
  func.func @_argmax_channels_single_kernel(%arg0: i32, %arg1: i32, %arg2: memref<1x4x256xf32, #tpu.memory_space<vmem>>, %arg3: memref<1x1x256xi32, #tpu.memory_space<vmem>>) attributes {dimension_semantics = [#tpu.dimension_semantics<parallel>, #tpu.dimension_semantics<parallel>], iteration_bounds = array<i64: 2, 1>, scalar_prefetch = 0 : i64, scratch_operands = 0 : i64, tpu.core_type = #tpu.core_type<tc>, window_params = [{transform_indices = @transform_0, window_bounds = array<i64: 1, 4, 256>}, {transform_indices = @transform_1, window_bounds = array<i64: 1, 1, 256>}]} {
    %c0 = arith.constant 0 : index
    %c0_0 = arith.constant 0 : index
    %c0_1 = arith.constant 0 : index
    %0 = vector.load %arg2[%c0, %c0_0, %c0_1] : memref<1x4x256xf32, #tpu.memory_space<vmem>>, vector<1x4x256xf32>
    %1 = vector.shape_cast %0 : vector<1x4x256xf32> to vector<4x256xf32>
    %cst = arith.constant dense<0xFF800000> : vector<256xf32>
    %2 = vector.multi_reduction <maximumf>, %1, %cst [0] : vector<4x256xf32> to vector<256xf32>
    %3 = vector.shape_cast %2 : vector<256xf32> to vector<1x256xf32>
    %4 = tpu.iota {dimensions = array<i32: 0>} : vector<4x256xi32>
    %5 = vector.broadcast %3 : vector<1x256xf32> to vector<4x256xf32>
    %6 = arith.cmpf oeq, %1, %5 : vector<4x256xf32>
    %c4_i32 = arith.constant 4 : i32
    %7 = vector.broadcast %c4_i32 : i32 to vector<4x256xi32>
    %8 = arith.select %6, %4, %7 : vector<4x256xi1>, vector<4x256xi32>
    %cst_2 = arith.constant dense<2147483647> : vector<256xi32>
    %9 = vector.multi_reduction <minsi>, %8, %cst_2 [0] : vector<4x256xi32> to vector<256xi32>
    %10 = vector.shape_cast %9 : vector<256xi32> to vector<1x256xi32>
    %c3_i32 = arith.constant 3 : i32
    %11 = vector.broadcast %c3_i32 : i32 to vector<1x256xi32>
    %12 = arith.minsi %10, %11 : vector<1x256xi32>
    %c0_3 = arith.constant 0 : index
    %c0_4 = arith.constant 0 : index
    %c0_5 = arith.constant 0 : index
    %13 = vector.load %arg3[%c0_3, %c0_4, %c0_5] : memref<1x1x256xi32, #tpu.memory_space<vmem>>, vector<1x1x256xi32>
    %14 = vector.shape_cast %13 : vector<1x1x256xi32> to vector<1x256xi32>
    %15 = vector.shape_cast %12 : vector<1x256xi32> to vector<1x1x256xi32>
    tpu.vector_store %arg3[%c0_3, %c0_4, %c0_5], %15 {strides = array<i32>} : memref<1x1x256xi32, #tpu.memory_space<vmem>>, vector<1x1x256xi32>,
    return
  }
  func.func @transform_0(%arg0: i32, %arg1: i32) -> (i32, i32, i32) {
    %c0_i32 = arith.constant 0 : i32
    %c0_i32_0 = arith.constant 0 : i32
    return %arg0, %c0_i32, %arg1 : i32, i32, i32
  }
  func.func @transform_1(%arg0: i32, %arg1: i32) -> (i32, i32, i32) {
    %c0_i32 = arith.constant 0 : i32
    %c0_i32_0 = arith.constant 0 : i32
    return %arg0, %c0_i32, %arg1 : i32, i32, i32
  }
}

</mosaic_0001>

<bundles_post_ra>
// kernel: tpu_custom_call.1
= control target key start
LH: loop header
LB: loop body
LE: loop exit
PB: predicated region body
PF: predicated region fallthrough
CT: control target
= control target key end

     0   :  { %6 = vsyncpa [#allocation3], 0  ;;  %s720_s0 = inlined_call_operand.hbm [shape: f32[2,4,256], index: 0, kind: input, shape index: {}]   ;;  %s721_s1 = inlined_call_operand.hbm [shape: s32[2,1,256], index: 1, kind: output, shape index: {}]  }
   0x1   :  { %8 = vsyncpa [#allocation3 + $0x1], 0 }
   0x2   :  { %9 = vsyncpa [#allocation4], 0 }
   0x3   :  { %11 = vsyncpa [#allocation4 + $0x1], 0  ;;  %s543_s6 = smov 0   ;;  %s545_s7 = smov 0  }
   0x4   :  { %s547_s8 = smov 0   ;;  %s549_s9 = smov 0  }
   0x5   :  { %s551_s10 = smov 0   ;;  %s553_s11 = smov 0  }
   0x6 LB: > { %s333_s12 = sadd.s32 4294967295, %s527_s11   ;;  %s334_s13 = sadd.s32 4294967294, %s527_s11   ;;  %s527_s11 = sphi %s553_s11, %s17_s11   ;;  %s523_s10 = sphi %s551_s10, %s737_s10   ;;  %s519_s9 = sphi %s549_s9, %s736_s9   ;;  %s515_s8 = sphi %s547_s8, %s735_s8   ;;  %s511_s7 = sphi %s545_s7, %s734_s7   ;;  %s507_s6 = sphi %s543_s6, %s733_s6  }
   0x7   : > { %s29_s14 = sadd.s32 1, %s523_s10  ;;  %s38_s15 = sadd.s32 1, %s515_s8 }
   0x8   : > { %p31_p0 = scmp.ge.s32.totalorder %s29_s14, 2  ;;  %p45_p1 = scmp.ne.s32.totalorder %s515_s8, %s511_s7 }
   0x9   : > { %p46_p2 = scmp.eq.s32.totalorder %s527_s11, 0  ;;  %p51_p3 = scmp.ne.s32.totalorder %s511_s7, %s507_s6 }
   0xa   : > { %s739_s14 = smov (%p31_p0, %s29_s14), 0  ;;  %p52_p5 = scmp.eq.s32.totalorder %s333_s12, 0 }
   0xb   : > { %p584_p4 = por %p46_p2, %p45_p1  ;;  %s33_s17 = ssub.s32 %s523_s10, %s739_s14 }
   0xc   : > { %p77_p6 = scmp.eq.s32.totalorder %s333_s12, 1  ;;  %p36_p7 = scmp.eq.s32.totalorder %s33_s17, 0 }
   0xd   : > { %p590_p8 = por %p52_p5, %p51_p3  ;;  %p83_p10 = scmp.eq.s32.totalorder %s334_s13, 1 }
   0xe   : > { %p594_p9 = por %p77_p6, %p45_p1  ;;  %p362_p13 = scmp.lt.s32.totalorder %s527_s11, 2 }
   0xf   : > { %s599_s20 = scalar_select %p36_p7, %s515_s8, %s38_s15  }
  0x10   : > { %s725_s19 = scalar_select %p594_p9, 1, 0 }
  0x11   : > { %p601_p11 = por %p83_p10, %p51_p3  ;;  %s103_s22 = sand.u32 1, %s515_s8  }
  0x12   : > { %s337_s23 = sshll.u32 %s103_s22, 3  ;;  %s348_s24 = sshll.u32 %s523_s10, 7 }
  0x13   : > { %s726_s21 = scalar_select %p601_p11, 1, 0 }
  0x14   : > { %s612_s27 = scalar_lea.hbm %s720_s0, %s348_s24  ;;  %s107_s28 = scalar_lea.vmem [#allocation2], %s337_s23 }
  0x15   : > { %s117_s29 = sshll.u32 %s107_s28, 4  ;;  %p618_p0 = pnand %p362_p13, %p584_p4  ;;  %s614_s29 = int_to_ptr.vmem [resolvable:$true] %s117_s29 }
  0x16   : > { %s104_s2 = scalar_lea.sflag [#allocation3], %s103_s22  ;;  %s415_s3 = scalar_lea.hbm %s612_s27, 128 }
  0x17   : > { %p416_p3 = scmp.ne.s32.totalorder %s612_s27, %s415_s3  ;;  %p417_p5 = pneg %p618_p0 }
  0x18   : > { %s420_s12 = scalar_lea.hbm %s720_s0, 256  ;;  %p421_p4 = scmp.lt.u32.totalorder %s612_s27, %s720_s0 }
  0x19   : > { %p418_p6 = pnand %p417_p5, %p416_p3  ;;  %p422_p10 = scmp.lt.u32.totalorder %s420_s12, %s415_s3 }
  0x1a   : > { %p424_p12 = scmp.lt.u32.totalorder %s415_s3, %s612_s27 }
  0x1b   : > { %p419_p7 = pneg %p418_p6  ;;  %p423_p13 = por %p422_p10, %p421_p4 }
  0x1d   : > { %p425_p1 = por %p424_p12, %p423_p13 }
  0x1f   : > { %p426_p2 = pnand %p425_p1, %p419_p7 }
  0x21   : > { %429 = shalt.err (!%p426_p2)
}
  0x22   : > { %s430_s16 = scalar_lea.vmem %s614_s29, 128  ;;  %s529_s17 = smov [#allocation2]  }
  0x23   : > { %p431_p3 = scmp.ne.s32.totalorder %s614_s29, %s430_s16  ;;  %s435_s22 = sshll.u32 %s529_s17, 4  ;;  %s436_s22 = int_to_ptr.vmem [resolvable:$false] %s435_s22 }
  0x24   : > { %s437_s23 = scalar_lea.vmem %s436_s22, 256  ;;  %p438_p9 = scmp.lt.s32.totalorder %s614_s29, %s436_s22 }
  0x25   : > { %p433_p6 = pnand %p431_p3, %p417_p5  ;;  %p439_p4 = scmp.lt.s32.totalorder %s437_s23, %s430_s16 }
  0x27   : > { %p434_p11 = pneg %p433_p6  ;;  %p440_p10 = por %p439_p4, %p438_p9 }
  0x29   : > { %p441_p12 = pnand %p440_p10, %p434_p11 }
  0x2b   : > { %444 = shalt.err (!%p441_p12)
}
  0x2c   : > { %357 = dma.hbm_to_vmem [thread:$0]  (!%p618_p0), %s612_s27, 128, %s614_s29, %s104_s2  }
  0x2d   : > { %p728_p1 = scmp.lt.s32.totalorder %s527_s11, 3  ;;  %p729_p2 = scmp.ge.s32.totalorder %s527_s11, 1 }
  0x2f   : > { %p123_p5 = pnand %p729_p2, %p728_p1 }
  0x30   : > { %s654_s24 = sand.u32 (!%p123_p5), 1, %s511_s7  }
  0x31   : > { %126 = sbr.rel (%p123_p5) target bundleno = 114 (0x72), region = 24  ;;  %s341_s25 = sshll.u32 (!%p123_p5), %s654_s24, 3 }
  0x32   : > { %s129_s26 = scalar_lea.sflag (!%p123_p5), [#allocation3], %s654_s24  ;;  %s132_s28 = scalar_lea.vmem (!%p123_p5), [#allocation2], %s341_s25 }
  0x38   : > { %498 = dma.done.wait (%p590_p8), %s129_s26, 128  }
  0x39   : > { %500 = vsyncadd (%p590_p8), %s129_s26, 4294967168  ;;  %vm157_vm0 = vcmask 1043456   ;;  %v153_v0 = vld [vmem:[%s132_s28] sm:$0xff]  ;;  %v172_v5 = vlaneseq  ;;  %v530_v6 = vmov 839922192   ;;  %s342_s18 = sshll.u32 %s654_s24, 1 }
  0x3a   : > { %v155_v1 = vcombine.high %v153_v0, %v153_v0  ;;  %v158_v2 = vsel %vm157_vm0, %v153_v0, -inf  ;;  %v180_v7 = vunpack.c.l.s4 %v530_v6  ;;  %v531_v34 = vmov 1966171168   ;;  %s150_s27 = scalar_lea.vmem [#allocation5], %s342_s18  ;;  %s349_s30 = sshll.u32 %s519_s9, 5 }
  0x3b   : > { %v159_v3 = vrot.slane %v158_v2, 4  ;;  %v173_v12 = vshrl.u32 %v172_v5, 7  ;;  %v214_v35 = vunpack.c.l.s4 %v531_v34  ;;  %s249_s29 = sshll.u32 %s150_s27, 4  ;;  %vm229_vm10 = vcmp.lt.s32.totalorder %v172_v5, 256  ;;  %s673_s4 = scalar_lea.hbm %s721_s1, %s349_s30  ;;  %s668_s29 = int_to_ptr.vmem [resolvable:$true] %s249_s29 }
  0x3c   : > { %v165_v4 = vsel %vm157_vm0, %v155_v1, -inf  ;;  %v181_v13 = vunpack.c.0.s8 %v180_v7  ;;  %s233_s5 = scalar_lea.sflag [#allocation4], %s654_s24  ;;  %s445_s12 = scalar_lea.vmem %s668_s29, 32 }
  0x3d   : > { %v160_v8 = vmax.f32 %v158_v2, %v159_v3  ;;  %v166_v9 = vrot.slane %v165_v4, 4  ;;  %v215_v40 = vunpack.c.0.s8 %v214_v35  ;;  %p446_p8 = scmp.ne.s32.totalorder %s668_s29, %s445_s12  ;;  %p730_p9 = scmp.ne.s32.totalorder %s725_s19, 0 }
  0x3e   : > { %v184_v18 = vsub.s32 %v181_v13, %v173_v12  ;;  %s532_s9 = smov [#allocation5]  }
  0x3f   : > { %v161_v10 = vrot.slane %v160_v8, 2  ;;  %v167_v11 = vmax.f32 %v165_v4, %v166_v9  ;;  %v218_v44 = vsub.s32 %v215_v40, %v173_v12  ;;  %p447_p11 = pnand %p446_p8, %p730_p9  ;;  %s449_s13 = sshll.u32 %s532_s9, 4  ;;  %s450_s13 = int_to_ptr.vmem [resolvable:$false] %s449_s13 }
  0x40   : > { %v185_v22 = vrot.slane %v173_v12, %v184_v18  ;;  %s451_s15 = scalar_lea.vmem %s450_s13, 64  ;;  %p452_p7 = scmp.lt.s32.totalorder %s668_s29, %s450_s13 }
  0x41   : > { %v162_v14 = vmax.f32 %v160_v8, %v161_v10  ;;  %v168_v15 = vrot.slane %v167_v11, 2  ;;  %p448_p0 = pneg %p447_p11  ;;  %p453_p13 = scmp.lt.s32.totalorder %s451_s15, %s445_s12 }
  0x43   : > { %v163_v16 = vrot.slane %v162_v14, 1  ;;  %v169_v17 = vmax.f32 %v167_v11, %v168_v15  ;;  %p454_p3 = por %p453_p13, %p452_p7 }
  0x45   : > { %v164_v19 = vmax.f32 %v162_v14, %v163_v16  ;;  %v170_v20 = vrot.slane %v169_v17, 1  ;;  %p455_p6 = pnand %p454_p3, %p448_p0 }
  0x47   : > { %v171_v21 = vmax.f32 %v169_v17, %v170_v20 }
  0x49   : > { %v176_v23 = vcombine.low %v164_v19, %v171_v21 }
  0x4b   : > { %vm178_vm1 = vcmp.eq.f32.partialorder %v153_v0, %v176_v23 }
  0x4c   : > { %v186_v24 = vsel %vm178_vm1, %v185_v22, 4 }
  0x4d   : > { %v187_v25 = vcombine.high %v186_v24, %v186_v24  ;;  %v188_v26 = vsel %vm157_vm0, %v186_v24, 2147483647 }
  0x4e   : > { %v189_v27 = vrot.slane %v188_v26, 4 }
  0x4f   : > { %v198_v28 = vsel %vm157_vm0, %v187_v25, 2147483647 }
  0x50   : > { %vm190_vm2 = vcmp.lt.s32.totalorder %v188_v26, %v189_v27  ;;  %v199_v29 = vrot.slane %v198_v28, 4 }
  0x51   : > { %v191_v30 = vsel %vm190_vm2, %v188_v26, %v189_v27 }
  0x52   : > { %v192_v31 = vrot.slane %v191_v30, 2  ;;  %vm200_vm3 = vcmp.lt.s32.totalorder %v198_v28, %v199_v29 }
  0x53   : > { %v201_v32 = vsel %vm200_vm3, %v198_v28, %v199_v29 }
  0x54   : > { %vm193_vm4 = vcmp.lt.s32.totalorder %v191_v30, %v192_v31  ;;  %v202_v33 = vrot.slane %v201_v32, 2 }
  0x55   : > { %v194_v36 = vsel %vm193_vm4, %v191_v30, %v192_v31 }
  0x56   : > { %v195_v37 = vrot.slane %v194_v36, 1  ;;  %vm203_vm5 = vcmp.lt.s32.totalorder %v201_v32, %v202_v33 }
  0x57   : > { %v204_v38 = vsel %vm203_vm5, %v201_v32, %v202_v33 }
  0x58   : > { %vm196_vm6 = vcmp.lt.s32.totalorder %v194_v36, %v195_v37  ;;  %v205_v39 = vrot.slane %v204_v38, 1 }
  0x59   : > { %v197_v41 = vsel %vm196_vm6, %v194_v36, %v195_v37 }
  0x5a   : > { %vm206_vm7 = vcmp.lt.s32.totalorder %v204_v38, %v205_v39  ;;  %vm208_vm8 = vcmp.lt.s32.totalorder %v197_v41, 3 }
  0x5b   : > { %v207_v42 = vsel %vm206_vm7, %v204_v38, %v205_v39  ;;  %v209_v43 = vsel %vm208_vm8, %v197_v41, 3 }
  0x5c   : > { %vm210_vm9 = vcmp.lt.s32.totalorder %v207_v42, 3 }
  0x5d   : > { %v211_v45 = vsel %vm210_vm9, %v207_v42, 3 }
  0x5e   : > { %v212_v46 = vcombine.low %v209_v43, %v211_v45 }
  0x60   : > { %v219_v47 = vrot.slane %v212_v46, %v218_v44 }
  0x62   : > { %v226_v48 = vrot.slane %v219_v47, %v218_v44 }
  0x64   : > { %231 = vst.msk [vmem:[%s150_s27] sm:$0x3] %vm229_vm10, %v226_v48 }
  0x65   : > { %458 = shalt.err (!%p455_p6)
}
  0x66   : > { %s459_s16 = scalar_lea.hbm %s673_s4, 32  ;;  %s463_s23 = scalar_lea.hbm %s721_s1, 64 }
  0x67   : > { %p460_p4 = scmp.ne.s32.totalorder %s673_s4, %s459_s16  ;;  %p464_p1 = scmp.lt.u32.totalorder %s673_s4, %s721_s1 }
  0x68   : > { %p465_p2 = scmp.lt.u32.totalorder %s463_s23, %s459_s16  ;;  %p467_p8 = scmp.lt.u32.totalorder %s459_s16, %s673_s4 }
  0x69   : > { %p461_p10 = pnand %p460_p4, %p730_p9 }
  0x6a   : > { %p466_p5 = por %p465_p2, %p464_p1 }
  0x6b   : > { %p462_p12 = pneg %p461_p10 }
  0x6c   : > { %p468_p11 = por %p467_p8, %p466_p5 }
  0x6e   : > { %p469_p0 = pnand %p468_p11, %p462_p12 }
  0x70   : > { %472 = shalt.err (!%p469_p0)
}
  0x71   : > { %352 = dma.vmem_to_hbm [thread:$0]  (%p730_p9), %s668_s29, 32, %s673_s4, %s233_s5  }
  0x72 PF: > { %s261_s26 = sand.u32 1, %s507_s6   ;;  %p731_p7 = scmp.ne.s32.totalorder %s726_s21, 0 }
  0x73   : > { %p732_p13 = scmp.ge.s32.totalorder %s527_s11, 2  ;;  %s262_s28 = scalar_lea.sflag [#allocation4], %s261_s26 }
  0x75   : > { %p359_p3 = pnand %p732_p13, %p731_p7 }
  0x77   : > { %502 = dma.done.wait (!%p359_p3), %s262_s28, 32  }
  0x78   : > { %504 = vsyncadd (!%p359_p3), %s262_s28, 4294967264  ;;  %s17_s11 = sadd.s32 1, %s527_s11   ;;  %s733_s6 = smov %s511_s7 }
  0x79   : > { %p14_p6 = scmp.ge.s32.totalorder %s17_s11, 4   ;;  %s734_s7 = smov %s515_s8 }
  0x7a   : > { %s735_s8 = smov %s599_s20  ;;  %s736_s9 = smov %s523_s10 }
  0x7b   : > { %s737_s10 = smov %s739_s14  ;;  %16 = sbr.rel (!%p14_p6) target bundleno = 6 (0x6), region = 69 }
  0x82   :  { %267 = vsyncpa [#allocation3], 1 }
  0x83   :  { %269 = vsyncpa [#allocation3 + $0x1], 1 }
  0x84   :  { %270 = vsyncpa [#allocation4], 1 }
  0x85   :  { %272 = vsyncpa [#allocation4 + $0x1], 1 }

</bundles_post_ra>
